<compile_context>
chip_gen: v7x
topology: tpu7x:2x2x1
jax: 0.10.0
libtpu: 0.0.40
codegen_flags: <defaults>
</compile_context>

<pallas_src>
import functools

import jax
import jax.numpy as jnp
from jax.experimental import pallas as pl
from jax.experimental.pallas import tpu as pltpu


def _link_predictor_kernel(xi_ref, xj_ref,
                           w1_ref, b1_ref,
                           w2_ref, b2_ref,
                           w3_ref, b3_ref,
                           o_ref):
    # Elementwise edge-feature product; upcast first (v5e VPU has no bf16 lanes).
    x = xi_ref[...].astype(jnp.float32) * xj_ref[...].astype(jnp.float32)   # (tile_n, in_c)

    # Layer 1 in transposed (feature-major) layout: h = relu(W1 @ x^T + b1).
    # 'oc,nc->on' contracts both operands on the feature axis (A @ B^T form), so no
    # explicit activation transpose is needed and the edge axis stays on lanes.
    h = jnp.einsum("oc,nc->on", w1_ref[...], x,
                   preferred_element_type=jnp.float32)                      # (hid, tile_n)
    h = jnp.maximum(h + b1_ref[...], 0.0)        # relu; dropout = identity (eval)

    # Layer 2: plain MXU matmul in the same layout.
    h = jnp.dot(w2_ref[...], h, preferred_element_type=jnp.float32)         # (hid, tile_n)
    h = jnp.maximum(h + b2_ref[...], 0.0)        # relu; dropout = identity (eval)

    # Layer 3 (out_channels == 1): VPU multiply + XLU sublane reduction instead of a
    # 1-wide MXU matmul; the result is already a lane-dense (1, tile_n) row.
    out = jnp.sum(h * w3_ref[...], axis=0, keepdims=True) + b3_ref[...]     # (1, tile_n)
    o_ref[...] = out.astype(o_ref.dtype)


def link_predictor_forward(x_i, x_j, params, *, tile_n=1024, out_dtype=jnp.float32):
    """params: list of (W, b) in torch Linear layout: W is (out, in), b is (out,)."""
    N, in_c = x_i.shape
    assert x_j.shape == (N, in_c)
    assert len(params) == 3, "this kernel is specialized for num_layers=3"

    (w1, b1), (w2, b2), (w3, b3) = params
    hid = w1.shape[0]
    out_c = w3.shape[0]
    assert out_c == 1, "this kernel is specialized for out_channels=1 (link scores)"

    # Weights stay in torch (out, in) layout: the transposed activation layout consumes
    # them directly.  Biases become columns; W3 becomes a (hid, 1) column.
    w1f, w2f = w1.astype(jnp.float32), w2.astype(jnp.float32)
    b1c = b1.astype(jnp.float32).reshape(hid, 1)
    b2c = b2.astype(jnp.float32).reshape(hid, 1)
    w3c = w3.astype(jnp.float32).T                      # (hid, 1)
    b3c = b3.astype(jnp.float32).reshape(1, 1)

    tile_n = min(tile_n, N)
    if tile_n < N:
        # lane-dense output block + (8,128)-friendly input block
        assert tile_n % 128 == 0, "tile_n must be a multiple of 128 when tiling N"
    grid = (pl.cdiv(N, tile_n),)

    row_spec = pl.BlockSpec((tile_n, in_c), lambda i: (i, 0))
    const = lambda shape: pl.BlockSpec(shape, lambda i: (0, 0))   # resident across grid

    # NOTE: if DMA latency is still exposed after the tile-size increase, add
    # pipeline_mode=pl.Buffered(3) to the two row_specs (sweep on real shapes).
    out2d = pl.pallas_call(
        _link_predictor_kernel,
        out_shape=jax.ShapeDtypeStruct((1, N), out_dtype),
        grid_spec=pltpu.PrefetchScalarGridSpec(
            num_scalar_prefetch=0,
            grid=grid,
            in_specs=[
                row_spec,                 # x_i tile   (tile_n, in_c)
                row_spec,                 # x_j tile   (tile_n, in_c)
                const((hid, in_c)),       # W1 (torch layout, replicated)
                const((hid, 1)),          # b1 column
                const((hid, hid)),        # W2 (torch layout)
                const((hid, 1)),          # b2 column
                const((hid, 1)),          # W3^T column
                const((1, 1)),            # b3
            ],
            out_specs=pl.BlockSpec((1, tile_n), lambda i: (0, i)),
        ),
        # Keep the grid multi-step + "parallel" so both v7x TensorCores are used.
        compiler_params=pltpu.CompilerParams(
            dimension_semantics=("parallel",)),
    )(x_i, x_j, w1f, b1c, w2f, b2c, w3c, b3c)

    # (1, N) -> (N, 1): contiguous reshape, free.
    return out2d.reshape(N, out_c)


def make_params(key, in_channels, hidden_channels, out_channels, num_layers):
    """Deterministic synthetic init mimicking torch.nn.Linear shapes."""
    dims = [in_channels] + [hidden_channels] * (num_layers - 1) + [out_channels]
    params = []
    for li in range(num_layers):
        fan_in, fan_out = dims[li], dims[li + 1]
        key, kw, kb = jax.random.split(key, 3)
        bound = 1.0 / jnp.sqrt(fan_in)
        w = jax.random.uniform(kw, (fan_out, fan_in), jnp.float32, -bound, bound)
        b = jax.random.uniform(kb, (fan_out,), jnp.float32, -bound, bound)
        params.append((w, b))
    return params


def reference_forward(x_i, x_j, params):
    x = x_i * x_j
    for w, b in params[:-1]:
        x = jnp.maximum(x @ w.T + b, 0.0)
    w, b = params[-1]
    return x @ w.T + b


if __name__ == "__main__":
    # 2048 candidate edges, in=32, hidden=32, out=1, num_layers=3: small & fast,
    # but enough rows for a 4-step parallel grid at tile_n=512.
    N, IN_C, HID, OUT_C, NUM_LAYERS = 2048, 32, 32, 1, 3
    DROPOUT = 0.5  # unused at inference

    key = jax.random.PRNGKey(0)
    k_i, k_j, k_p = jax.random.split(key, 3)
    # Stream activations as bf16 (halves HBM read traffic); kernel upcasts to f32.
    x_i = jax.random.normal(k_i, (N, IN_C), jnp.float32).astype(jnp.bfloat16)
    x_j = jax.random.normal(k_j, (N, IN_C), jnp.float32).astype(jnp.bfloat16)
    params = make_params(k_p, IN_C, HID, OUT_C, NUM_LAYERS)

    fwd = jax.jit(functools.partial(link_predictor_forward, tile_n=512))
    out = jax.block_until_ready(fwd(x_i, x_j, params))

    # Reference uses the same bf16-rounded inputs upcast to f32 (same math as the
    # kernel, modulo matmul accumulation order / MXU precision) -> modest tolerance.
    ref = reference_forward(x_i.astype(jnp.float32), x_j.astype(jnp.float32), params)
    assert out.shape == (N, OUT_C)
    err = float(jnp.max(jnp.abs(out - ref)))
    assert jnp.allclose(out, ref, atol=2e-3, rtol=2e-3), f"max abs err {err}"

    print("KERNEL_OK")
</pallas_src>

<mosaic_0001>
module attributes {stable_mosaic.version = 11 : i64} {
  func.func @_link_predictor_kernel(%arg0: i32, %arg1: memref<512x32xbf16, #tpu.memory_space<vmem>>, %arg2: memref<512x32xbf16, #tpu.memory_space<vmem>>, %arg3: memref<32x32xf32, #tpu.memory_space<vmem>>, %arg4: memref<32x1xf32, #tpu.memory_space<vmem>>, %arg5: memref<32x32xf32, #tpu.memory_space<vmem>>, %arg6: memref<32x1xf32, #tpu.memory_space<vmem>>, %arg7: memref<32x1xf32, #tpu.memory_space<vmem>>, %arg8: memref<1x1xf32, #tpu.memory_space<vmem>>, %arg9: memref<1x512xf32, #tpu.memory_space<vmem>>) attributes {dimension_semantics = [#tpu.dimension_semantics<parallel>], iteration_bounds = array<i64: 4>, scalar_prefetch = 0 : i64, scratch_operands = 0 : i64, tpu.core_type = #tpu.core_type<tc>, window_params = [{transform_indices = @transform_0, window_bounds = array<i64: 512, 32>}, {transform_indices = @transform_1, window_bounds = array<i64: 512, 32>}, {pipeline_mode = #tpu.pipeline_mode<synchronous>, transform_indices = @transform_2, window_bounds = array<i64: 32, 32>}, {pipeline_mode = #tpu.pipeline_mode<synchronous>, transform_indices = @transform_3, window_bounds = array<i64: 32, 1>}, {pipeline_mode = #tpu.pipeline_mode<synchronous>, transform_indices = @transform_4, window_bounds = array<i64: 32, 32>}, {pipeline_mode = #tpu.pipeline_mode<synchronous>, transform_indices = @transform_5, window_bounds = array<i64: 32, 1>}, {pipeline_mode = #tpu.pipeline_mode<synchronous>, transform_indices = @transform_6, window_bounds = array<i64: 32, 1>}, {pipeline_mode = #tpu.pipeline_mode<synchronous>, transform_indices = @transform_7, window_bounds = array<i64: 1, 1>}, {transform_indices = @transform_8, window_bounds = array<i64: 1, 512>}]} {
    %c0 = arith.constant 0 : index
    %c0_0 = arith.constant 0 : index
    %0 = vector.load %arg1[%c0, %c0_0] : memref<512x32xbf16, #tpu.memory_space<vmem>>, vector<512x32xbf16>
    %1 = arith.extf %0 : vector<512x32xbf16> to vector<512x32xf32>
    %c0_1 = arith.constant 0 : index
    %c0_2 = arith.constant 0 : index
    %2 = vector.load %arg2[%c0_1, %c0_2] : memref<512x32xbf16, #tpu.memory_space<vmem>>, vector<512x32xbf16>
    %3 = arith.extf %2 : vector<512x32xbf16> to vector<512x32xf32>
    %4 = arith.mulf %1, %3 : vector<512x32xf32>
    %c0_3 = arith.constant 0 : index
    %c0_4 = arith.constant 0 : index
    %5 = vector.load %arg3[%c0_3, %c0_4] : memref<32x32xf32, #tpu.memory_space<vmem>>, vector<32x32xf32>
    "tpu.trace_start"() <{level = 10 : i32, message = "oc,nc->on"}> : () -> ()
    %cst = arith.constant dense<0.000000e+00> : vector<32x512xf32>
    %6 = tpu.matmul %5, %4, %cst {dimension_numbers = #tpu.dot_dimension_numbers<[1], [1], [0], [0], [0, 0, 1, 0], [], []>} : vector<32x32xf32>, vector<512x32xf32>, vector<32x512xf32> -> vector<32x512xf32>
    "tpu.trace_stop"() : () -> ()
    %c0_5 = arith.constant 0 : index
    %c0_6 = arith.constant 0 : index
    %7 = vector.load %arg4[%c0_5, %c0_6] : memref<32x1xf32, #tpu.memory_space<vmem>>, vector<32x1xf32>
    %8 = vector.broadcast %7 : vector<32x1xf32> to vector<32x512xf32>
    %9 = arith.addf %6, %8 : vector<32x512xf32>
    %cst_7 = arith.constant 0.000000e+00 : f32
    %10 = vector.broadcast %cst_7 : f32 to vector<32x512xf32>
    %11 = arith.maximumf %9, %10 : vector<32x512xf32>
    %c0_8 = arith.constant 0 : index
    %c0_9 = arith.constant 0 : index
    %12 = vector.load %arg5[%c0_8, %c0_9] : memref<32x32xf32, #tpu.memory_space<vmem>>, vector<32x32xf32>
    %cst_10 = arith.constant dense<0.000000e+00> : vector<32x512xf32>
    %13 = tpu.matmul %12, %11, %cst_10 {dimension_numbers = #tpu.dot_dimension_numbers<[1], [0], [0], [1], [0, 0, 1, 1], [], []>} : vector<32x32xf32>, vector<32x512xf32>, vector<32x512xf32> -> vector<32x512xf32>
    %c0_11 = arith.constant 0 : index
    %c0_12 = arith.constant 0 : index
    %14 = vector.load %arg6[%c0_11, %c0_12] : memref<32x1xf32, #tpu.memory_space<vmem>>, vector<32x1xf32>
    %15 = vector.broadcast %14 : vector<32x1xf32> to vector<32x512xf32>
    %16 = arith.addf %13, %15 : vector<32x512xf32>
    %cst_13 = arith.constant 0.000000e+00 : f32
    %17 = vector.broadcast %cst_13 : f32 to vector<32x512xf32>
    %18 = arith.maximumf %16, %17 : vector<32x512xf32>
    %c0_14 = arith.constant 0 : index
    %c0_15 = arith.constant 0 : index
    %19 = vector.load %arg7[%c0_14, %c0_15] : memref<32x1xf32, #tpu.memory_space<vmem>>, vector<32x1xf32>
    %20 = vector.broadcast %19 : vector<32x1xf32> to vector<32x512xf32>
    %21 = arith.mulf %18, %20 : vector<32x512xf32>
    %cst_16 = arith.constant dense<0.000000e+00> : vector<512xf32>
    %22 = vector.multi_reduction <add>, %21, %cst_16 [0] : vector<32x512xf32> to vector<512xf32>
    %23 = vector.shape_cast %22 : vector<512xf32> to vector<1x512xf32>
    %c0_17 = arith.constant 0 : index
    %c0_18 = arith.constant 0 : index
    %24 = vector.load %arg8[%c0_17, %c0_18] : memref<1x1xf32, #tpu.memory_space<vmem>>, vector<1x1xf32>
    %25 = vector.broadcast %24 : vector<1x1xf32> to vector<1x512xf32>
    %26 = arith.addf %23, %25 : vector<1x512xf32>
    %c0_19 = arith.constant 0 : index
    %c0_20 = arith.constant 0 : index
    %27 = vector.load %arg9[%c0_19, %c0_20] : memref<1x512xf32, #tpu.memory_space<vmem>>, vector<1x512xf32>
    tpu.vector_store %arg9[%c0_19, %c0_20], %26 {strides = array<i32>} : memref<1x512xf32, #tpu.memory_space<vmem>>, vector<1x512xf32>,
    return
  }
  func.func @transform_0(%arg0: i32) -> (i32, i32) {
    %c0_i32 = arith.constant 0 : i32
    %c0_i32_0 = arith.constant 0 : i32
    return %arg0, %c0_i32 : i32, i32
  }
  func.func @transform_1(%arg0: i32) -> (i32, i32) {
    %c0_i32 = arith.constant 0 : i32
    %c0_i32_0 = arith.constant 0 : i32
    return %arg0, %c0_i32 : i32, i32
  }
  func.func @transform_2(%arg0: i32) -> (i32, i32) {
    %c0_i32 = arith.constant 0 : i32
    %c0_i32_0 = arith.constant 0 : i32
    %c0_i32_1 = arith.constant 0 : i32
    return %c0_i32, %c0_i32_0 : i32, i32
  }
  func.func @transform_3(%arg0: i32) -> (i32, i32) {
    %c0_i32 = arith.constant 0 : i32
    %c0_i32_0 = arith.constant 0 : i32
    %c0_i32_1 = arith.constant 0 : i32
    return %c0_i32, %c0_i32_0 : i32, i32
  }
  func.func @transform_4(%arg0: i32) -> (i32, i32) {
    %c0_i32 = arith.constant 0 : i32
    %c0_i32_0 = arith.constant 0 : i32
    %c0_i32_1 = arith.constant 0 : i32
    return %c0_i32, %c0_i32_0 : i32, i32
  }
  func.func @transform_5(%arg0: i32) -> (i32, i32) {
    %c0_i32 = arith.constant 0 : i32
    %c0_i32_0 = arith.constant 0 : i32
    %c0_i32_1 = arith.constant 0 : i32
    return %c0_i32, %c0_i32_0 : i32, i32
  }
  func.func @transform_6(%arg0: i32) -> (i32, i32) {
    %c0_i32 = arith.constant 0 : i32
    %c0_i32_0 = arith.constant 0 : i32
    %c0_i32_1 = arith.constant 0 : i32
    return %c0_i32, %c0_i32_0 : i32, i32
  }
  func.func @transform_7(%arg0: i32) -> (i32, i32) {
    %c0_i32 = arith.constant 0 : i32
    %c0_i32_0 = arith.constant 0 : i32
    %c0_i32_1 = arith.constant 0 : i32
    return %c0_i32, %c0_i32_0 : i32, i32
  }
  func.func @transform_8(%arg0: i32) -> (i32, i32) {
    %c0_i32 = arith.constant 0 : i32
    %c0_i32_0 = arith.constant 0 : i32
    return %c0_i32, %arg0 : i32, i32
  }
}

</mosaic_0001>

<bundles_post_ra>
// kernel: link_predictor_forward.1
= control target key start
LH: loop header
LB: loop body
LE: loop exit
PB: predicated region body
PF: predicated region fallthrough
CT: control target
= control target key end

     0   :  { %s2631_s0 = inlined_call_operand.vmem [shape: bf16[2048,32], index: 0, kind: input, shape index: {}]   ;;  %s2632_s1 = inlined_call_operand.vmem [shape: bf16[2048,32], index: 1, kind: input, shape index: {}]   ;;  %s2633_s2 = inlined_call_operand.vmem [shape: f32[32,32], index: 2, kind: input, shape index: {}]   ;;  %s2634_s3 = inlined_call_operand.vmem [shape: f32[32,1], index: 3, kind: input, shape index: {}]   ;;  %s2635_s4 = inlined_call_operand.vmem [shape: f32[32,32], index: 4, kind: input, shape index: {}]   ;;  %s2636_s5 = inlined_call_operand.vmem [shape: f32[32,1], index: 5, kind: input, shape index: {}]   ;;  %s2637_s6 = inlined_call_operand.vmem [shape: f32[32,1], index: 6, kind: input, shape index: {}]   ;;  %s2638_s7 = inlined_call_operand.<no memory space> [shape: f32[1,1], index: 7, kind: input, shape index: {}]   ;;  %s2639_s8 = inlined_call_operand.hbm [shape: f32[1,2048], index: 8, kind: output, shape index: {}]  }
   0x1   :  { %v13_v0 = vstv %s2638_s7 }
   0x2   :  { %14 = vst [vmem:[#allocation2] sm:$0x1] %v13_v0 }
   0x3   :  { %15 = vsyncpa [#allocation4], 0 }
   0x4   :  { %17 = vsyncpa [#allocation4 + $0x1], 0  ;;  %s2287_s29 = smov 0   ;;  %s2289_s30 = smov 0  }
   0x5   :  { %s2291_s9 = smov 0   ;;  %s2293_s10 = smov 0  }
   0x6 LB: > { %s1521_s7 = sadd.s32 4294967295, %s2233_s10   ;;  %s1522_s11 = sadd.s32 4294967294, %s2233_s10   ;;  %s2233_s10 = sphi %s2293_s10, %s2647_s10   ;;  %s2229_s9 = sphi %s2291_s9, %s2646_s9   ;;  %s2225_s30 = sphi %s2289_s30, %s2645_s30   ;;  %s2221_s29 = sphi %s2287_s29, %s2644_s29  }
   0x7   : > { %s2310_s12 = sadd.s32 1, %s2233_s10   ;;  %s208_s13 = sadd.s32 1, %s2229_s9 }
   0x8   : > { %s205_s14 = ssub.s32 %s2233_s10, %s2310_s12  ;;  %p218_p0 = scmp.ne.s32.totalorder %s2229_s9, %s2225_s30 }
   0x9   : > { %p206_p1 = scmp.eq.s32.totalorder %s205_s14, 0  ;;  %p219_p2 = scmp.eq.s32.totalorder %s1521_s7, 3 }
   0xa   : > { %p224_p3 = scmp.ne.s32.totalorder %s2225_s30, %s2221_s29  ;;  %p225_p4 = scmp.eq.s32.totalorder %s1522_s11, 3 }
   0xb   : > { %s2320_s15 = scalar_select %p206_p1, %s2229_s9, %s208_s13  }
   0xc   : > { %p2322_p5 = por %p219_p2, %p218_p0  ;;  %p2326_p6 = por %p225_p4, %p224_p3 }
   0xd   : > { %p1525_p7 = scmp.ge.s32.totalorder %s2233_s10, 1  ;;  %p279_p8 = scmp.lt.s32.totalorder %s2233_s10, 5 }
   0xf   : > { %p280_p9 = pnand %p1525_p7, %p279_p8 }
  0x10   : > { %s2332_s18 = sshll.u32 (!%p280_p9), %s1521_s7, 6  ;;  %vm679_vm0 = vcmask (!%p280_p9), 261120   ;;  %v2337_v1 = vld [vmem:[%s2633_s2] sm:$0xff] (!%p280_p9)  ;;  %v2235_v3 = vmov (!%p280_p9), 0   ;;  %v657_v4 = vld [vmem:[%s2634_s3 + $0x10] sm:$0xff] (!%p280_p9)  ;;  %v656_v5 = vld [vmem:[%s2634_s3 + $0x8] sm:$0xff] (!%p280_p9) }
  0x11   : > { %283 = sbr.rel (%p280_p9) target bundleno = 610 (0x262), region = 52  ;;  %p319_p10 = scmp.lt.s32.totalorder (!%p280_p9), %s2332_s18, 255  ;;  %1967 = vmatprep.mubr.msk.f32.mxu0 (!%p280_p9), %vm679_vm0, %v2337_v1  ;;  %2007 = vmatprep.mubr.msk.f32.mxu1 (!%p280_p9), %vm679_vm0, %v2337_v1  ;;  %v655_v2 = vld [vmem:[%s2634_s3] sm:$0xff] (!%p280_p9)  ;;  %v658_v6 = vld [vmem:[%s2634_s3 + $0x18] sm:$0xff] (!%p280_p9)  ;;  %v1083_v8 = vld [vmem:[%s2636_s5 + $0x8] sm:$0xff] (!%p280_p9) }
  0x12   : > { %2169 = vset.pattern.permute.xlu0 (!%p280_p9), %v2235_v3  ;;  %2170 = vset.pattern.permute.xlu1 (!%p280_p9), %v2235_v3  ;;  %v1082_v7 = vld [vmem:[%s2636_s5] sm:$0xff] (!%p280_p9)  ;;  %vm2383_vm1 = vmpackc.low (!%p280_p9), %vm679_vm0, %vm679_vm0  ;;  %v1084_v41 = vld [vmem:[%s2636_s5 + $0x10] sm:$0xff] (!%p280_p9)  ;;  %s2589_s13 = scalar_lea.hbm (!%p280_p9), %s2639_s8, %s2332_s18  ;;  %s2238_s21 = smov (!%p280_p9), [#allocation3]  }
  0x13   : > { %661 = vperm.xlu0 (!%p280_p9), %2169, %v655_v2   ;;  %671 = vperm.xlu1 (!%p280_p9), %2170, %v657_v4   ;;  %v1085_v47 = vld [vmem:[%s2636_s5 + $0x18] sm:$0xff] (!%p280_p9)  ;;  %v1312_v0 = vld [vmem:[%s2637_s6] sm:$0xff] (!%p280_p9)  ;;  %s2175_s23 = sshll.u32 (!%p280_p9), %s2238_s21, 4  ;;  %s2176_s23 = int_to_ptr.vmem [resolvable:$false] %s2175_s23 }
  0x14   : > { %v654_v29 = vld [vmem:[%s2633_s2 + $0x18] sm:$0xff] (!%p280_p9)  ;;  %s2177_s24 = scalar_lea.vmem (!%p280_p9), %s2176_s23, 128 }
  0x17   : > { %666 = vperm.xlu0 (!%p280_p9), %2169, %v656_v5   ;;  %676 = vperm.xlu1 (!%p280_p9), %2170, %v658_v6   ;;  %v1313_v6 = vld [vmem:[%s2637_s6 + $0x8] sm:$0xff] (!%p280_p9) }
  0x18   : > { %s320_s25 = scalar_select %p319_p10, %s2332_s18, 255 }
  0x1a   : > { %s1528_s11 = sshll.u32 %s320_s25, 2 }
  0x1b   : > { %s2360_s19 = scalar_lea.vmem %s2631_s0, %s1528_s11  ;;  %s2365_s22 = scalar_lea.vmem %s2632_s1, %s1528_s11  ;;  %1088 = vperm.xlu0 %2169, %v1082_v7   ;;  %1093 = vperm.xlu1 %2170, %v1083_v8  }
  0x1c   : > { %v1880_v9 = vld [vmem:[%s2360_s19 + $0x40] sm:$0xff]   ;;  %v1881_v34 = vld [vmem:[%s2360_s19 + $0x48] sm:$0xff]  }
  0x1d   : > { %v1911_v10 = vld [vmem:[%s2365_s22 + $0x40] sm:$0xff]   ;;  %v1651_v12 = vunpack.c.l.bf16 %v1880_v9  ;;  %v1652_v13 = vunpack.c.h.bf16 %v1880_v9  ;;  %v1912_v35 = vld [vmem:[%s2365_s22 + $0x48] sm:$0xff]   ;;  %v1655_v49 = vunpack.c.l.bf16 %v1881_v34  ;;  %v1656_v50 = vunpack.c.h.bf16 %v1881_v34 }
  0x1e   : > { %v1896_v11 = vld [vmem:[%s2360_s19 + $0xc0] sm:$0xff]   ;;  %v1779_v14 = vunpack.c.l.bf16 %v1911_v10  ;;  %v1780_v15 = vunpack.c.h.bf16 %v1911_v10  ;;  %v1897_v40 = vld [vmem:[%s2360_s19 + $0xc8] sm:$0xff]   ;;  %v1783_v51 = vunpack.c.l.bf16 %v1912_v35  ;;  %v1784_v55 = vunpack.c.h.bf16 %v1912_v35  ;;  %v1905_v35 = vld [vmem:[%s2365_s22 + $0x10] sm:$0xff]  }
  0x1f   : > { %v1927_v16 = vld [vmem:[%s2365_s22 + $0xc0] sm:$0xff]   ;;  %v1715_v19 = vunpack.c.l.bf16 %v1896_v11  ;;  %v1716_v20 = vunpack.c.h.bf16 %v1896_v11  ;;  %v1928_v46 = vld [vmem:[%s2365_s22 + $0xc8] sm:$0xff]   ;;  %v1719_v56 = vunpack.c.l.bf16 %v1897_v40  ;;  %1098 = vperm.xlu0 %2169, %v1084_v41   ;;  %v1720_v59 = vunpack.c.h.bf16 %v1897_v40  ;;  %1103 = vperm.xlu1 %2170, %v1085_v47   ;;  %v1882_v11 = vld [vmem:[%s2360_s19 + $0x50] sm:$0xff]  }
  0x20   : > { %v1618_v17 = vld [vmem:[%s2360_s19] sm:$0xff]   ;;  %v1843_v21 = vunpack.c.l.bf16 %v1927_v16  ;;  %v1844_v22 = vunpack.c.h.bf16 %v1927_v16  ;;  %v603_v25 = vmul.f32 %v1779_v14, %v1651_v12  ;;  %v604_v26 = vmul.f32 %v1780_v15, %v1652_v13  ;;  %v1873_v52 = vld [vmem:[%s2360_s19 + $0x8] sm:$0xff]   ;;  %v1913_v12 = vld [vmem:[%s2365_s22 + $0x50] sm:$0xff]  }
  0x21   : > { %v1746_v18 = vld [vmem:[%s2365_s22] sm:$0xff]   ;;  %v1619_v27 = vunpack.c.l.bf16 %v1618_v17  ;;  %v1620_v28 = vunpack.c.h.bf16 %v1618_v17  ;;  %v1904_v57 = vld [vmem:[%s2365_s22 + $0x8] sm:$0xff]   ;;  %v605_v58 = vmul.f32 %v1783_v51, %v1655_v49  ;;  %v1847_v60 = vunpack.c.l.bf16 %v1928_v46  ;;  %v1898_v17 = vld [vmem:[%s2360_s19 + $0xd0] sm:$0xff]  }
  0x22   : > { %v1888_v23 = vld [vmem:[%s2360_s19 + $0x80] sm:$0xff]   ;;  %v635_v30 = vmul.f32 %v1843_v21, %v1715_v19  ;;  %v636_v31 = vmul.f32 %v1844_v22, %v1716_v20  ;;  %v1747_v32 = vunpack.c.l.bf16 %v1746_v18  ;;  %v1748_v33 = vunpack.c.h.bf16 %v1746_v18  ;;  %v1889_v62 = vld [vmem:[%s2360_s19 + $0x88] sm:$0xff]   ;;  %v1929_v22 = vld [vmem:[%s2365_s22 + $0xd0] sm:$0xff]  }
  0x23   : > { %v1919_v24 = vld [vmem:[%s2365_s22 + $0x80] sm:$0xff]   ;;  %v2015_v36 = vpack.c.bf16 %v604_v26, %v603_v25  ;;  %v1683_v37 = vunpack.c.l.bf16 %v1888_v23  ;;  %v1684_v38 = vunpack.c.h.bf16 %v1888_v23  ;;  %v1848_v61 = vunpack.c.h.bf16 %v1928_v46  ;;  %v1920_v63 = vld [vmem:[%s2365_s22 + $0x88] sm:$0xff]   ;;  %1318 = vperm.xlu0 %2169, %v1312_v0   ;;  %v1314_v23 = vld [vmem:[%s2637_s6 + $0x10] sm:$0xff]  ;;  %1323 = vperm.xlu1 %2170, %v1313_v6  }
  0x24   : > { %v1811_v39 = vunpack.c.l.bf16 %v1919_v24  ;;  %v2063_v42 = vpack.c.bf16 %v636_v31, %v635_v30  ;;  %v587_v43 = vmul.f32 %v1747_v32, %v1619_v27  ;;  %v588_v44 = vmul.f32 %v1748_v33, %v1620_v28  ;;  %v1874_v28 = vld [vmem:[%s2360_s19 + $0x10] sm:$0xff]   ;;  %v1315_v30 = vld [vmem:[%s2637_s6 + $0x18] sm:$0xff]  ;;  %v1388_v46 = vld [vmem:[#allocation2] sm:$0x1] }
  0x25   : > { %v1812_v45 = vunpack.c.h.bf16 %v1919_v24  ;;  %2017 = vmatprep.subr.msk.bf16.mxu0 %vm2383_vm1, %v2015_v36  ;;  %v606_v3 = vmul.f32 %v1784_v55, %v1656_v50  ;;  %v1623_v4 = vunpack.c.l.bf16 %v1873_v52  ;;  %v1624_v5 = vunpack.c.h.bf16 %v1873_v52  ;;  %v1890_v40 = vld [vmem:[%s2360_s19 + $0x90] sm:$0xff]   ;;  %v1883_v51 = vld [vmem:[%s2360_s19 + $0x58] sm:$0xff]  }
  0x26   : > { %v619_v48 = vmul.f32 %v1811_v39, %v1683_v37  ;;  %2065 = vmatprep.subr.msk.bf16.mxu1 %vm2383_vm1, %v2063_v42  ;;  %v2018_v53 = vpack.c.bf16 %v588_v44, %v587_v43  ;;  %v637_v7 = vmul.f32 %v1847_v60, %v1719_v56  ;;  %v638_v8 = vmul.f32 %v1848_v61, %v1720_v59  ;;  %v1921_v41 = vld [vmem:[%s2365_s22 + $0x90] sm:$0xff]   ;;  %v1914_v52 = vld [vmem:[%s2365_s22 + $0x58] sm:$0xff]  }
  0x27   : > { %v620_v54 = vmul.f32 %v1812_v45, %v1684_v38  ;;  %v1751_v9 = vunpack.c.l.bf16 %v1904_v57  ;;  %v1752_v10 = vunpack.c.h.bf16 %v1904_v57  ;;  %v2021_v13 = vpack.c.bf16 %v606_v3, %v605_v58  ;;  %1328 = vperm.xlu0 %2169, %v1314_v23   ;;  %1333 = vperm.xlu1 %2170, %v1315_v30   ;;  %v1899_v57 = vld [vmem:[%s2360_s19 + $0xd8] sm:$0xff]  }
  0x28   : > { %2020 = vmatpush3.bf16.xpose.msk.msra.mxu0 %vm2383_vm1, %v2018_v53  ;;  %v1687_v14 = vunpack.c.l.bf16 %v1889_v62  ;;  %v1688_v15 = vunpack.c.h.bf16 %v1889_v62  ;;  %v1815_v16 = vunpack.c.l.bf16 %v1920_v63  ;;  %v2069_v18 = vpack.c.bf16 %v638_v8, %v637_v7  ;;  %v1930_v62 = vld [vmem:[%s2365_s22 + $0xd8] sm:$0xff]  }
  0x29   : > { %v2066_v2 = vpack.c.bf16 %v620_v54, %v619_v48  ;;  %v589_v19 = vmul.f32 %v1751_v9, %v1623_v4  ;;  %v590_v20 = vmul.f32 %v1752_v10, %v1624_v5  ;;  %v1816_v21 = vunpack.c.h.bf16 %v1920_v63  ;;  %2023 = vmatprep.subr.msk.bf16.mxu0 %vm2383_vm1, %v2021_v13  ;;  %v1875_v4 = vld [vmem:[%s2360_s19 + $0x18] sm:$0xff]  }
  0x2a   : > { %v621_v24 = vmul.f32 %v1815_v16, %v1687_v14  ;;  %v1659_v25 = vunpack.c.l.bf16 %v1882_v11  ;;  %v1660_v26 = vunpack.c.h.bf16 %v1882_v11  ;;  %v1787_v27 = vunpack.c.l.bf16 %v1913_v12  ;;  %v1906_v9 = vld [vmem:[%s2365_s22 + $0x18] sm:$0xff]  }
  0x2b   : > { %2068 = vmatpush3.bf16.xpose.msk.msra.mxu1 %vm2383_vm1, %v2066_v2  ;;  %v2024_v31 = vpack.c.bf16 %v590_v20, %v589_v19  ;;  %v622_v32 = vmul.f32 %v1816_v21, %v1688_v15  ;;  %v1788_v33 = vunpack.c.h.bf16 %v1913_v12  ;;  %v1723_v34 = vunpack.c.l.bf16 %v1898_v17  ;;  %1391 = vperm.xlu0 %2169, %v1388_v46   ;;  %v1891_v14 = vld [vmem:[%s2360_s19 + $0x98] sm:$0xff]   ;;  %v1907_v46 = vld [vmem:[%s2365_s22 + $0x20] sm:$0xff]  }
  0x2c   : > { %2071 = vmatprep.subr.msk.bf16.mxu1 %vm2383_vm1, %v2069_v18  ;;  %v607_v36 = vmul.f32 %v1787_v27, %v1659_v25  ;;  %v1724_v37 = vunpack.c.h.bf16 %v1898_v17  ;;  %v1851_v38 = vunpack.c.l.bf16 %v1929_v22  ;;  %v1852_v39 = vunpack.c.h.bf16 %v1929_v22  ;;  %v1922_v15 = vld [vmem:[%s2365_s22 + $0x98] sm:$0xff]   ;;  %v1915_v25 = vld [vmem:[%s2365_s22 + $0x60] sm:$0xff]  }
  0x2d   : > { %v2072_v42 = vpack.c.bf16 %v622_v32, %v621_v24  ;;  %v608_v43 = vmul.f32 %v1788_v33, %v1660_v26  ;;  %v1627_v44 = vunpack.c.l.bf16 %v1874_v28  ;;  %v1628_v45 = vunpack.c.h.bf16 %v1874_v28  ;;  %v1884_v24 = vld [vmem:[%s2360_s19 + $0x60] sm:$0xff]  }
  0x2e   : > { %v639_v47 = vmul.f32 %v1851_v38, %v1723_v34  ;;  %v640_v48 = vmul.f32 %v1852_v39, %v1724_v37  ;;  %v1755_v49 = vunpack.c.l.bf16 %v1905_v35  ;;  %v1756_v50 = vunpack.c.h.bf16 %v1905_v35 }
  0x2f   : > { %v2027_v53 = vpack.c.bf16 %v608_v43, %v607_v36  ;;  %v1691_v54 = vunpack.c.l.bf16 %v1890_v40  ;;  %v1692_v55 = vunpack.c.h.bf16 %v1890_v40  ;;  %v1819_v56 = vunpack.c.l.bf16 %v1921_v41  ;;  %v1931_v36 = vld [vmem:[%s2365_s22 + $0xe0] sm:$0xff]  }
  0x30   : > { %2026 = vmatpush3.bf16.xpose.msk.msra.mxu0 %vm2383_vm1, %v2024_v31  ;;  %v2075_v58 = vpack.c.bf16 %v640_v48, %v639_v47  ;;  %v591_v59 = vmul.f32 %v1755_v49, %v1627_v44  ;;  %v592_v60 = vmul.f32 %v1756_v50, %v1628_v45  ;;  %v1820_v61 = vunpack.c.h.bf16 %v1921_v41  ;;  %v1900_v31 = vld [vmem:[%s2360_s19 + $0xe0] sm:$0xff]  }
  0x31   : > { %2029 = vmatprep.subr.msk.bf16.mxu0 %vm2383_vm1, %v2027_v53  ;;  %v623_v63 = vmul.f32 %v1819_v56, %v1691_v54  ;;  %v1663_v0 = vunpack.c.l.bf16 %v1883_v51  ;;  %v1664_v2 = vunpack.c.h.bf16 %v1883_v51  ;;  %v1791_v3 = vunpack.c.l.bf16 %v1914_v52  ;;  %v1876_v41 = vld [vmem:[%s2360_s19 + $0x20] sm:$0xff]  }
  0x32   : > { %v2030_v5 = vpack.c.bf16 %v592_v60, %v591_v59  ;;  %v624_v6 = vmul.f32 %v1820_v61, %v1692_v55  ;;  %v1792_v7 = vunpack.c.h.bf16 %v1914_v52  ;;  %v1727_v8 = vunpack.c.l.bf16 %v1899_v57  ;;  %v1892_v51 = vld [vmem:[%s2360_s19 + $0xa0] sm:$0xff]   ;;  %v1885_v61 = vld [vmem:[%s2360_s19 + $0x68] sm:$0xff]  }
  0x33   : > { %2074 = vmatpush3.bf16.xpose.msk.msra.mxu1 %vm2383_vm1, %v2072_v42  ;;  %v609_v10 = vmul.f32 %v1791_v3, %v1663_v0  ;;  %v1728_v11 = vunpack.c.h.bf16 %v1899_v57  ;;  %v1855_v12 = vunpack.c.l.bf16 %v1930_v62  ;;  %v1856_v13 = vunpack.c.h.bf16 %v1930_v62  ;;  %v1923_v52 = vld [vmem:[%s2365_s22 + $0xa0] sm:$0xff]   ;;  %v1916_v62 = vld [vmem:[%s2365_s22 + $0x68] sm:$0xff]  }
  0x34   : > { %2077 = vmatprep.subr.msk.bf16.mxu1 %vm2383_vm1, %v2075_v58  ;;  %v2078_v16 = vpack.c.bf16 %v624_v6, %v623_v63  ;;  %v610_v17 = vmul.f32 %v1792_v7, %v1664_v2  ;;  %v1631_v18 = vunpack.c.l.bf16 %v1875_v4  ;;  %v1632_v19 = vunpack.c.h.bf16 %v1875_v4  ;;  %v1901_v4 = vld [vmem:[%s2360_s19 + $0xe8] sm:$0xff]  }
  0x35   : > { %v641_v20 = vmul.f32 %v1855_v12, %v1727_v8  ;;  %v642_v21 = vmul.f32 %v1856_v13, %v1728_v11  ;;  %v1759_v22 = vunpack.c.l.bf16 %v1906_v9  ;;  %v1760_v23 = vunpack.c.h.bf16 %v1906_v9  ;;  %v1932_v9 = vld [vmem:[%s2365_s22 + $0xe8] sm:$0xff]  }
  0x36   : > { %v2033_v26 = vpack.c.bf16 %v610_v17, %v609_v10  ;;  %v1695_v27 = vunpack.c.l.bf16 %v1891_v14  ;;  %v1696_v28 = vunpack.c.h.bf16 %v1891_v14  ;;  %v1823_v30 = vunpack.c.l.bf16 %v1922_v15  ;;  %v1877_v14 = vld [vmem:[%s2360_s19 + $0x28] sm:$0xff]  }
  0x37   : > { %v2081_v32 = vpack.c.bf16 %v642_v21, %v641_v20  ;;  %v593_v33 = vmul.f32 %v1759_v22, %v1631_v18  ;;  %v594_v34 = vmul.f32 %v1760_v23, %v1632_v19  ;;  %v1824_v35 = vunpack.c.h.bf16 %v1922_v15  ;;  %v1908_v19 = vld [vmem:[%s2365_s22 + $0x28] sm:$0xff]  }
  0x38   : > { %2032 = vmatpush3.bf16.xpose.msk.msra.mxu0 %vm2383_vm1, %v2030_v5  ;;  %v625_v37 = vmul.f32 %v1823_v30, %v1695_v27  ;;  %v1667_v38 = vunpack.c.l.bf16 %v1884_v24  ;;  %v1668_v39 = vunpack.c.h.bf16 %v1884_v24  ;;  %v1795_v40 = vunpack.c.l.bf16 %v1915_v25  ;;  %v1893_v24 = vld [vmem:[%s2360_s19 + $0xa8] sm:$0xff]  }
  0x39   : > { %2035 = vmatprep.subr.msk.bf16.mxu0 %vm2383_vm1, %v2033_v26  ;;  %v2036_v42 = vpack.c.bf16 %v594_v34, %v593_v33  ;;  %v626_v43 = vmul.f32 %v1824_v35, %v1696_v28  ;;  %v1796_v44 = vunpack.c.h.bf16 %v1915_v25  ;;  %v1731_v45 = vunpack.c.l.bf16 %v1900_v31  ;;  %v1924_v25 = vld [vmem:[%s2365_s22 + $0xa8] sm:$0xff]   ;;  %v1886_v35 = vld [vmem:[%s2360_s19 + $0x70] sm:$0xff]  }
  0x3a   : > { %v611_v47 = vmul.f32 %v1795_v40, %v1667_v38  ;;  %v1732_v48 = vunpack.c.h.bf16 %v1900_v31  ;;  %v1859_v49 = vunpack.c.l.bf16 %v1931_v36  ;;  %v1860_v50 = vunpack.c.h.bf16 %v1931_v36  ;;  %v1917_v36 = vld [vmem:[%s2365_s22 + $0x70] sm:$0xff]  }
  0x3b   : > { %2080 = vmatpush3.bf16.xpose.msk.msra.mxu1 %vm2383_vm1, %v2078_v16  ;;  %v2084_v53 = vpack.c.bf16 %v626_v43, %v625_v37  ;;  %v612_v54 = vmul.f32 %v1796_v44, %v1668_v39  ;;  %v1635_v55 = vunpack.c.l.bf16 %v1876_v41  ;;  %v1636_v56 = vunpack.c.h.bf16 %v1876_v41  ;;  %v1902_v41 = vld [vmem:[%s2360_s19 + $0xf0] sm:$0xff]  }
  0x3c   : > { %2083 = vmatprep.subr.msk.bf16.mxu1 %vm2383_vm1, %v2081_v32  ;;  %v643_v57 = vmul.f32 %v1859_v49, %v1731_v45  ;;  %v644_v58 = vmul.f32 %v1860_v50, %v1732_v48  ;;  %v1763_v59 = vunpack.c.l.bf16 %v1907_v46  ;;  %v1764_v60 = vunpack.c.h.bf16 %v1907_v46  ;;  %v1933_v46 = vld [vmem:[%s2365_s22 + $0xf0] sm:$0xff]  }
  0x3d   : > { %v2039_v63 = vpack.c.bf16 %v612_v54, %v611_v47  ;;  %v1699_v0 = vunpack.c.l.bf16 %v1892_v51  ;;  %v1700_v2 = vunpack.c.h.bf16 %v1892_v51  ;;  %v1827_v3 = vunpack.c.l.bf16 %v1923_v52  ;;  %v1878_v50 = vld [vmem:[%s2360_s19 + $0x30] sm:$0xff]  }
  0x3e   : > { %v2087_v5 = vpack.c.bf16 %v644_v58, %v643_v57  ;;  %v595_v6 = vmul.f32 %v1763_v59, %v1635_v55  ;;  %v596_v7 = vmul.f32 %v1764_v60, %v1636_v56  ;;  %v1828_v8 = vunpack.c.h.bf16 %v1923_v52  ;;  %v1909_v55 = vld [vmem:[%s2365_s22 + $0x30] sm:$0xff]  }
  0x3f   : > { %v627_v10 = vmul.f32 %v1827_v3, %v1699_v0  ;;  %v1671_v11 = vunpack.c.l.bf16 %v1885_v61  ;;  %v1672_v12 = vunpack.c.h.bf16 %v1885_v61  ;;  %v1799_v13 = vunpack.c.l.bf16 %v1916_v62  ;;  %v1894_v60 = vld [vmem:[%s2360_s19 + $0xb0] sm:$0xff]  }
  0x40   : > { %2038 = vmatpush3.bf16.xpose.msk.msra.mxu0 %vm2383_vm1, %v2036_v42  ;;  %v2042_v15 = vpack.c.bf16 %v596_v7, %v595_v6  ;;  %v628_v16 = vmul.f32 %v1828_v8, %v1700_v2  ;;  %v1800_v17 = vunpack.c.h.bf16 %v1916_v62  ;;  %v1735_v18 = vunpack.c.l.bf16 %v1901_v4  ;;  %v1925_v61 = vld [vmem:[%s2365_s22 + $0xb0] sm:$0xff]   ;;  %v1887_v7 = vld [vmem:[%s2360_s19 + $0x78] sm:$0xff]  }
  0x41   : > { %2041 = vmatprep.subr.msk.bf16.mxu0 %vm2383_vm1, %v2039_v63  ;;  %v613_v20 = vmul.f32 %v1799_v13, %v1671_v11  ;;  %v1736_v21 = vunpack.c.h.bf16 %v1901_v4  ;;  %v1863_v22 = vunpack.c.l.bf16 %v1932_v9  ;;  %v1864_v23 = vunpack.c.h.bf16 %v1932_v9  ;;  %v1918_v8 = vld [vmem:[%s2365_s22 + $0x78] sm:$0xff]  }
  0x42   : > { %v2090_v26 = vpack.c.bf16 %v628_v16, %v627_v10  ;;  %v614_v27 = vmul.f32 %v1800_v17, %v1672_v12  ;;  %v1639_v28 = vunpack.c.l.bf16 %v1877_v14  ;;  %v1640_v30 = vunpack.c.h.bf16 %v1877_v14  ;;  %v1903_v13 = vld [vmem:[%s2360_s19 + $0xf8] sm:$0xff]  }
  0x43   : > { %2086 = vmatpush3.bf16.xpose.msk.msra.mxu1 %vm2383_vm1, %v2084_v53  ;;  %v645_v31 = vmul.f32 %v1863_v22, %v1735_v18  ;;  %v646_v32 = vmul.f32 %v1864_v23, %v1736_v21  ;;  %v1767_v33 = vunpack.c.l.bf16 %v1908_v19  ;;  %v1768_v34 = vunpack.c.h.bf16 %v1908_v19  ;;  %v1934_v18 = vld [vmem:[%s2365_s22 + $0xf8] sm:$0xff]  }
  0x44   : > { %2089 = vmatprep.subr.msk.bf16.mxu1 %vm2383_vm1, %v2087_v5  ;;  %v2045_v37 = vpack.c.bf16 %v614_v27, %v613_v20  ;;  %v1703_v38 = vunpack.c.l.bf16 %v1893_v24  ;;  %v1704_v39 = vunpack.c.h.bf16 %v1893_v24  ;;  %v1831_v40 = vunpack.c.l.bf16 %v1924_v25 }
  0x45   : > { %v2093_v42 = vpack.c.bf16 %v646_v32, %v645_v31  ;;  %v597_v43 = vmul.f32 %v1767_v33, %v1639_v28  ;;  %v598_v44 = vmul.f32 %v1768_v34, %v1640_v30  ;;  %v1832_v45 = vunpack.c.h.bf16 %v1924_v25  ;;  %v1879_v32 = vld [vmem:[%s2360_s19 + $0x38] sm:$0xff]  }
  0x46   : > { %v1675_v47 = vunpack.c.l.bf16 %v1886_v35  ;;  %v1676_v48 = vunpack.c.h.bf16 %v1886_v35  ;;  %v1803_v49 = vunpack.c.l.bf16 %v1917_v36  ;;  %v629_v51 = vmul.f32 %v1831_v40, %v1703_v38  ;;  %v1910_v33 = vld [vmem:[%s2365_s22 + $0x38] sm:$0xff]  }
  0x47   : > { %v630_v52 = vmul.f32 %v1832_v45, %v1704_v39  ;;  %v1804_v53 = vunpack.c.h.bf16 %v1917_v36  ;;  %v1739_v54 = vunpack.c.l.bf16 %v1902_v41  ;;  %v1740_v57 = vunpack.c.h.bf16 %v1902_v41  ;;  %v1895_v38 = vld [vmem:[%s2360_s19 + $0xb8] sm:$0xff]   ;;  %s315_s19 = sand.u32 1, %s2225_s30  }
  0x48   : > { %2044 = vmatpush3.bf16.xpose.msk.msra.mxu0 %vm2383_vm1, %v2042_v15  ;;  %v615_v56 = vmul.f32 %v1803_v49, %v1675_v47  ;;  %v1867_v58 = vunpack.c.l.bf16 %v1933_v46  ;;  %v1868_v59 = vunpack.c.h.bf16 %v1933_v46  ;;  %v2048_v62 = vpack.c.bf16 %v598_v44, %v597_v43  ;;  %v1926_v39 = vld [vmem:[%s2365_s22 + $0xb8] sm:$0xff]   ;;  %s1526_s22 = sshll.u32 %s315_s19, 2  ;;  %s1437_s14 = scalar_lea.sflag [#allocation4], %s315_s19 }
  0x49   : > { %2047 = vmatprep.subr.msk.bf16.mxu0 %vm2383_vm1, %v2045_v37  ;;  %v616_v63 = vmul.f32 %v1804_v53, %v1676_v48  ;;  %v1643_v0 = vunpack.c.l.bf16 %v1878_v50  ;;  %v1644_v2 = vunpack.c.h.bf16 %v1878_v50  ;;  %v1771_v5 = vunpack.c.l.bf16 %v1909_v55  ;;  %s317_s27 = scalar_lea.vmem [#allocation3], %s1526_s22 }
  0x4a   : > { %v647_v3 = vmul.f32 %v1867_v58, %v1739_v54  ;;  %v648_v4 = vmul.f32 %v1868_v59, %v1740_v57  ;;  %v1772_v6 = vunpack.c.h.bf16 %v1909_v55  ;;  %v1707_v10 = vunpack.c.l.bf16 %v1894_v60  ;;  %v652_v57 = vld [vmem:[%s2633_s2 + $0x8] sm:$0xff]  ;;  %v653_v58 = vld [vmem:[%s2633_s2 + $0x10] sm:$0xff]  ;;  %s1451_s28 = sshll.u32 %s317_s27, 4  ;;  %s2591_s28 = int_to_ptr.vmem [resolvable:$true] %s1451_s28 }
  0x4b   : > { %2092 = vmatpush3.bf16.xpose.msk.msra.mxu1 %vm2383_vm1, %v2090_v26  ;;  %v2051_v9 = vpack.c.bf16 %v616_v63, %v615_v56  ;;  %v1708_v11 = vunpack.c.h.bf16 %v1894_v60  ;;  %v1835_v12 = vunpack.c.l.bf16 %v1925_v61  ;;  %v2096_v14 = vpack.c.bf16 %v630_v52, %v629_v51  ;;  %s2171_s20 = scalar_lea.vmem %s2591_s28, 64  ;;  %p2178_p0 = scmp.lt.s32.totalorder %s2591_s28, %s2176_s23 }
  0x4c   : > { %2095 = vmatprep.subr.msk.bf16.mxu1 %vm2383_vm1, %v2093_v42  ;;  %v2099_v15 = vpack.c.bf16 %v648_v4, %v647_v3  ;;  %v599_v16 = vmul.f32 %v1771_v5, %v1643_v0  ;;  %v1836_v17 = vunpack.c.h.bf16 %v1925_v61  ;;  %v600_v19 = vmul.f32 %v1772_v6, %v1644_v2  ;;  %p2172_p11 = scmp.ne.s32.totalorder %s2591_s28, %s2171_s20  ;;  %p2179_p1 = scmp.lt.s32.totalorder %s2177_s24, %s2171_s20 }
  0x4d   : > { %v1679_v20 = vunpack.c.l.bf16 %v1887_v7  ;;  %v1680_v21 = vunpack.c.h.bf16 %v1887_v7  ;;  %v1807_v22 = vunpack.c.l.bf16 %v1918_v8  ;;  %v631_v23 = vmul.f32 %v1835_v12, %v1707_v10 }
  0x4e   : > { %v632_v24 = vmul.f32 %v1836_v17, %v1708_v11  ;;  %v1808_v25 = vunpack.c.h.bf16 %v1918_v8  ;;  %v1743_v26 = vunpack.c.l.bf16 %v1903_v13  ;;  %v1744_v28 = vunpack.c.h.bf16 %v1903_v13  ;;  %p2173_p12 = pnand %p2172_p11, %p2322_p5  ;;  %p2180_p2 = por %p2179_p1, %p2178_p0 }
  0x4f   : > { %v617_v27 = vmul.f32 %v1807_v22, %v1679_v20  ;;  %v1871_v30 = vunpack.c.l.bf16 %v1934_v18  ;;  %v1872_v31 = vunpack.c.h.bf16 %v1934_v18  ;;  %v2054_v35 = vpack.c.bf16 %v600_v19, %v599_v16 }
  0x50   : > { %2050 = vmatpush3.bf16.xpose.msk.msra.mxu0 %vm2383_vm1, %v2048_v62  ;;  %v618_v34 = vmul.f32 %v1808_v25, %v1680_v21  ;;  %v1647_v40 = vunpack.c.l.bf16 %v1879_v32  ;;  %v1648_v41 = vunpack.c.h.bf16 %v1879_v32  ;;  %v1775_v42 = vunpack.c.l.bf16 %v1910_v33  ;;  %p2174_p13 = pneg %p2173_p12 }
  0x51   : > { %2053 = vmatprep.subr.msk.bf16.mxu0 %vm2383_vm1, %v2051_v9  ;;  %v649_v36 = vmul.f32 %v1871_v30, %v1743_v26  ;;  %v650_v37 = vmul.f32 %v1872_v31, %v1744_v28  ;;  %v1776_v43 = vunpack.c.h.bf16 %v1910_v33  ;;  %v2102_v44 = vpack.c.bf16 %v632_v24, %v631_v23 }
  0x52   : > { %v2057_v45 = vpack.c.bf16 %v618_v34, %v617_v27  ;;  %v1711_v46 = vunpack.c.l.bf16 %v1895_v38  ;;  %v1712_v47 = vunpack.c.h.bf16 %v1895_v38  ;;  %v1839_v48 = vunpack.c.l.bf16 %v1926_v39  ;;  %p2181_p3 = pnand %p2180_p2, %p2174_p13 }
  0x53   : > { %2098 = vmatpush3.bf16.xpose.msk.msra.mxu1 %vm2383_vm1, %v2096_v14  ;;  %v1840_v49 = vunpack.c.h.bf16 %v1926_v39  ;;  %v2105_v50 = vpack.c.bf16 %v650_v37, %v649_v36  ;;  %v601_v51 = vmul.f32 %v1775_v42, %v1647_v40  ;;  %v602_v52 = vmul.f32 %v1776_v43, %v1648_v41 }
  0x54   : > { %2101 = vmatprep.subr.msk.bf16.mxu1 %vm2383_vm1, %v2099_v15  ;;  %v633_v53 = vmul.f32 %v1839_v48, %v1711_v46 }
  0x55   : > { %v634_v54 = vmul.f32 %v1840_v49, %v1712_v47  ;;  %v2060_v55 = vpack.c.bf16 %v602_v52, %v601_v51 }
  0x57   : > { %v2108_v56 = vpack.c.bf16 %v634_v54, %v633_v53 }
  0x58   : > { %2056 = vmatpush3.bf16.xpose.msk.msra.mxu0 %vm2383_vm1, %v2054_v35 }
  0x59   : > { %2059 = vmatprep.subr.msk.bf16.mxu0 %vm2383_vm1, %v2057_v45 }
  0x5b   : > { %2104 = vmatpush3.bf16.xpose.msk.msra.mxu1 %vm2383_vm1, %v2102_v44 }
  0x5c   : > { %2107 = vmatprep.subr.msk.bf16.mxu1 %vm2383_vm1, %v2105_v50 }
  0x60   : > { %2062 = vmatpush3.bf16.xpose.msk.msra.mxu0 %vm2383_vm1, %v2060_v55 }
  0x63   : > { %2110 = vmatpush3.bf16.xpose.msk.msra.mxu1 %vm2383_vm1, %v2108_v56 }
  0x67   : > { %1968 = vmatmul.mubr.msk.f32.vlgmr.msra.gmra.mrb[0].mxu0 %vm679_vm0, %v2337_v1 }
  0x68   : > { %1969 = vmatprep.mubr.msk.f32.mxu0 %vm679_vm0, %v652_v57 }
  0x6a   : > { %2008 = vmatmul.mubr.msk.f32.vlgmr.msra.gmra.mrb[0].mxu1 %vm679_vm0, %v2337_v1  ;;  %v2236_v1 = vmov 0.0  }
  0x6b   : > { %2009 = vmatprep.mubr.msk.f32.mxu1 %vm679_vm0, %v652_v57  ;;  %1970 = vmatmul.mubr.msk.f32.gmra.mrb[2].mxu0 %vm679_vm0, %v652_v57 }
  0x6c   : > { %1971 = vmatprep.mubr.msk.f32.mxu0 %vm679_vm0, %v653_v58 }
  0x6e   : > { %2010 = vmatmul.mubr.msk.f32.gmra.mrb[2].mxu1 %vm679_vm0, %v652_v57  ;;  %v1078_v57 = vld [vmem:[%s2635_s4] sm:$0xff] }
  0x6f   : > { %2011 = vmatprep.mubr.msk.f32.mxu1 %vm679_vm0, %v653_v58  ;;  %1972 = vmatmul.mubr.msk.f32.gmra.mrb[4].mxu0 %vm679_vm0, %v653_v58 }
  0x70   : > { %1973 = vmatprep.mubr.msk.f32.mxu0 %vm679_vm0, %v654_v29 }
  0x72   : > { %2012 = vmatmul.mubr.msk.f32.gmra.mrb[4].mxu1 %vm679_vm0, %v653_v58  ;;  %v1079_v58 = vld [vmem:[%s2635_s4 + $0x8] sm:$0xff] }
  0x73   : > { %2013 = vmatprep.mubr.msk.f32.mxu1 %vm679_vm0, %v654_v29  ;;  %1974 = vmatmul.mubr.msk.f32.gmra.mrb[6].mxu0 %vm679_vm0, %v654_v29 }
  0x74   : > { %1182 = vmatprep.mubr.f32.mxu0 %v2236_v1 }
  0x76   : > { %2014 = vmatmul.mubr.msk.f32.gmra.mrb[6].mxu1 %vm679_vm0, %v654_v29  ;;  %v1080_v29 = vld [vmem:[%s2635_s4 + $0x10] sm:$0xff] }
  0x77   : > { %1271 = vmatprep.mubr.f32.mxu1 %v2236_v1 }
  0x92   : > { %v662_v59 = vpop.permute.xlu0 %661  ;;  %v672_v8 = vpop.permute.xlu1 %671 }
  0x96   : > { %v667_v2 = vpop.permute.xlu0 %666  ;;  %v677_v32 = vpop.permute.xlu1 %676 }
 0x13a   : > { %v950_v60 = vpop.f32.mrb[0].mxu0 }
 0x13b   : > { %v952_v61 = vpop.f32.mrb[1].mxu0  ;;  %v951_v63 = vadd.f32 %v950_v60, %v662_v59  ;;  %v1089_v60 = vpop.permute.xlu0 %1088 }
 0x13c   : > { %v953_v3 = vadd.f32 %v952_v61, %v662_v59  ;;  %v1094_v61 = vpop.permute.xlu1 %1093 }
 0x13d   : > { %v1039_v62 = vpop.f32.mrb[0].mxu1  ;;  %v1062_v12 = vmax.f32 %v951_v63, 0.0 }
 0x13e   : > { %v1041_v0 = vpop.f32.mrb[1].mxu1  ;;  %v956_v4 = vpop.f32.mrb[2].mxu0  ;;  %v1040_v5 = vadd.f32 %v1039_v62, %v662_v59  ;;  %v1063_v16 = vmax.f32 %v953_v3, 0.0 }
 0x13f   : > { %v957_v6 = vadd.f32 %v956_v4, %v667_v2  ;;  %v958_v7 = vpop.f32.mrb[3].mxu0  ;;  %v1042_v9 = vadd.f32 %v1041_v0, %v662_v59  ;;  %v1081_v59 = vld [vmem:[%s2635_s4 + $0x18] sm:$0xff]  ;;  %v1099_v62 = vpop.permute.xlu0 %1098 }
 0x140   : > { %v959_v11 = vadd.f32 %v958_v7, %v667_v2  ;;  %v1064_v20 = vmax.f32 %v1040_v5, 0.0  ;;  %v2578_v3 = vpop.permute.xlu1 %1103 }
 0x141   : > { %v1045_v10 = vpop.f32.mrb[2].mxu1  ;;  %v1066_v13 = vmax.f32 %v957_v6, 0.0  ;;  %v1065_v24 = vmax.f32 %v1042_v9, 0.0 }
 0x142   : > { %v1046_v14 = vadd.f32 %v1045_v10, %v667_v2  ;;  %v1047_v15 = vpop.f32.mrb[3].mxu1  ;;  %v1067_v17 = vmax.f32 %v959_v11, 0.0  ;;  %v962_v19 = vpop.f32.mrb[4].mxu0 }
 0x143   : > { %v1048_v18 = vadd.f32 %v1047_v15, %v667_v2  ;;  %v2113_v21 = vpack.c.bf16 %v1066_v13, %v1062_v12  ;;  %v964_v23 = vpop.f32.mrb[5].mxu0  ;;  %v963_v30 = vadd.f32 %v962_v19, %v672_v8 }
 0x144   : > { %v1068_v22 = vmax.f32 %v1046_v14, 0.0  ;;  %v2111_v25 = vpack.c.bf16 %v1067_v17, %v1063_v16  ;;  %v965_v34 = vadd.f32 %v964_v23, %v672_v8  ;;  %v1319_v14 = vpop.permute.xlu0 %1318 }
 0x145   : > { %v1069_v26 = vmax.f32 %v1048_v18, 0.0  ;;  %v1051_v27 = vpop.f32.mrb[4].mxu1  ;;  %v1070_v42 = vmax.f32 %v963_v30, 0.0 }
 0x146   : > { %v2121_v28 = vpack.c.bf16 %v1068_v22, %v1064_v20  ;;  %v1053_v31 = vpop.f32.mrb[5].mxu1  ;;  %v968_v35 = vpop.f32.mrb[6].mxu0  ;;  %2112 = vmatprep.subr.bf16.mxu0 %v2111_v25  ;;  %v1052_v36 = vadd.f32 %v1051_v27, %v672_v8  ;;  %v1071_v46 = vmax.f32 %v965_v34, 0.0 }
 0x147   : > { %v2119_v33 = vpack.c.bf16 %v1069_v26, %v1065_v24  ;;  %v969_v37 = vadd.f32 %v968_v35, %v677_v32  ;;  %v970_v38 = vpop.f32.mrb[7].mxu0  ;;  %2114 = vmatpush1.bf16.msra.mxu0 %v2113_v21  ;;  %v1054_v39 = vadd.f32 %v1053_v31, %v672_v8  ;;  %v1324_v21 = vpop.permute.xlu1 %1323 }
 0x148   : > { %v971_v41 = vadd.f32 %v970_v38, %v677_v32  ;;  %v1072_v49 = vmax.f32 %v1052_v36, 0.0 }
 0x149   : > { %v1057_v40 = vpop.f32.mrb[6].mxu1  ;;  %2120 = vmatprep.subr.bf16.mxu1 %v2119_v33  ;;  %v1074_v43 = vmax.f32 %v969_v37, 0.0  ;;  %v1073_v52 = vmax.f32 %v1054_v39, 0.0 }
 0x14a   : > { %v1058_v44 = vadd.f32 %v1057_v40, %v677_v32  ;;  %v1059_v45 = vpop.f32.mrb[7].mxu1  ;;  %2122 = vmatpush1.bf16.msra.mxu1 %v2121_v28  ;;  %v1075_v47 = vmax.f32 %v971_v41, 0.0 }
 0x14b   : > { %v1060_v48 = vadd.f32 %v1059_v45, %v677_v32  ;;  %v2117_v50 = vpack.c.bf16 %v1074_v43, %v1070_v42  ;;  %v1329_v43 = vpop.permute.xlu0 %1328 }
 0x14c   : > { %v1076_v51 = vmax.f32 %v1058_v44, 0.0  ;;  %v2115_v53 = vpack.c.bf16 %v1075_v47, %v1071_v46 }
 0x14d   : > { %v1077_v54 = vmax.f32 %v1060_v48, 0.0 }
 0x14e   : > { %v2125_v55 = vpack.c.bf16 %v1076_v51, %v1072_v49  ;;  %2116 = vmatprep.subr.bf16.mxu0 %v2115_v53 }
 0x14f   : > { %v2123_v56 = vpack.c.bf16 %v1077_v54, %v1073_v52  ;;  %2118 = vmatpush1.bf16.msra.mxu0 %v2117_v50 }
 0x151   : > { %2124 = vmatprep.subr.bf16.mxu1 %v2123_v56 }
 0x152   : > { %2126 = vmatpush1.bf16.msra.mxu1 %v2125_v55  ;;  %1603 = vmatmul.mubr.msk.f32.vlgmr.msra.gmra.mrb[8].mxu0 %vm679_vm0, %v1078_v57 }
 0x153   : > { %1188 = vmatprep.mubr.f32.mxu0 %v2236_v1 }
 0x155   : > { %1607 = vmatmul.mubr.msk.f32.vlgmr.msra.gmra.mrb[8].mxu1 %vm679_vm0, %v1078_v57 }
 0x156   : > { %1277 = vmatprep.mubr.f32.mxu1 %v2236_v1  ;;  %1604 = vmatmul.mubr.msk.f32.gmra.mrb[10].mxu0 %vm679_vm0, %v1079_v58 }
 0x157   : > { %1194 = vmatprep.mubr.f32.mxu0 %v2236_v1 }
 0x159   : > { %1608 = vmatmul.mubr.msk.f32.gmra.mrb[10].mxu1 %vm679_vm0, %v1079_v58 }
 0x15a   : > { %1283 = vmatprep.mubr.f32.mxu1 %v2236_v1  ;;  %1605 = vmatmul.mubr.msk.f32.gmra.mrb[12].mxu0 %vm679_vm0, %v1080_v29 }
 0x15b   : > { %1200 = vmatprep.mubr.f32.mxu0 %v2236_v1 }
 0x15d   : > { %1609 = vmatmul.mubr.msk.f32.gmra.mrb[12].mxu1 %vm679_vm0, %v1080_v29 }
 0x15e   : > { %1289 = vmatprep.mubr.f32.mxu1 %v2236_v1  ;;  %1606 = vmatmul.mubr.msk.f32.gmra.mrb[14].mxu0 %vm679_vm0, %v1081_v59 }
 0x161   : > { %1610 = vmatmul.mubr.msk.f32.gmra.mrb[14].mxu1 %vm679_vm0, %v1081_v59 }
 0x225   : > { %v1184_v63 = vpop.f32.mrb[8].mxu0 }
 0x226   : > { %v1185_v0 = vadd.f32 %v1184_v63, %v1089_v60  ;;  %v1186_v2 = vpop.f32.mrb[9].mxu0 }
 0x227   : > { %v1187_v5 = vadd.f32 %v1186_v2, %v1089_v60 }
 0x228   : > { %v1273_v4 = vpop.f32.mrb[8].mxu1  ;;  %v1296_v8 = vmax.f32 %v1185_v0, 0.0 }
 0x229   : > { %v1274_v6 = vadd.f32 %v1273_v4, %v1089_v60  ;;  %v1275_v7 = vpop.f32.mrb[9].mxu1  ;;  %v1297_v9 = vmax.f32 %v1187_v5, 0.0  ;;  %v1190_v1 = vpop.f32.mrb[10].mxu0 }
 0x22a   : > { %v1276_v10 = vadd.f32 %v1275_v7, %v1089_v60  ;;  %v1191_v12 = vadd.f32 %v1190_v1, %v1094_v61  ;;  %v1192_v13 = vpop.f32.mrb[11].mxu0  ;;  %v1336_v22 = vmul.f32 %v1319_v14, %v1296_v8 }
 0x22b   : > { %v1298_v11 = vmax.f32 %v1274_v6, 0.0  ;;  %v1193_v17 = vadd.f32 %v1192_v13, %v1094_v61  ;;  %v1337_v23 = vmul.f32 %v1319_v14, %v1297_v9 }
 0x22c   : > { %v1299_v15 = vmax.f32 %v1276_v10, 0.0  ;;  %v1279_v16 = vpop.f32.mrb[10].mxu1  ;;  %v1300_v18 = vmax.f32 %v1191_v12, 0.0 }
 0x22d   : > { %v1280_v19 = vadd.f32 %v1279_v16, %v1094_v61  ;;  %v1281_v20 = vpop.f32.mrb[11].mxu1  ;;  %v1301_v24 = vmax.f32 %v1193_v17, 0.0  ;;  %v1196_v26 = vpop.f32.mrb[12].mxu0  ;;  %v1338_v27 = vmul.f32 %v1319_v14, %v1298_v11  ;;  %v1394_v11 = vlaneseq }
 0x22e   : > { %v1282_v25 = vadd.f32 %v1281_v20, %v1094_v61  ;;  %v1340_v28 = vmul.f32 %v1324_v21, %v1300_v18  ;;  %v1197_v31 = vadd.f32 %v1196_v26, %v1099_v62  ;;  %v1198_v32 = vpop.f32.mrb[13].mxu0  ;;  %v1339_v33 = vmul.f32 %v1319_v14, %v1299_v15 }
 0x22f   : > { %v1302_v30 = vmax.f32 %v1280_v19, 0.0  ;;  %v1341_v34 = vmul.f32 %v1324_v21, %v1301_v24  ;;  %v1199_v37 = vadd.f32 %v1198_v32, %v1099_v62  ;;  %v1395_v20 = vshrl.u32 %v1394_v11, 7 }
 0x230   : > { %v1303_v35 = vmax.f32 %v1282_v25, 0.0  ;;  %v1285_v36 = vpop.f32.mrb[12].mxu1  ;;  %v1352_v38 = vadd.f32 %v1340_v28, %v1336_v22  ;;  %v1304_v40 = vmax.f32 %v1197_v31, 0.0  ;;  %v2237_v26 = vmov 1966171168  }
 0x231   : > { %v1342_v39 = vmul.f32 %v1324_v21, %v1302_v30  ;;  %v1286_v41 = vadd.f32 %v1285_v36, %v1099_v62  ;;  %v1287_v42 = vpop.f32.mrb[13].mxu1  ;;  %v1361_v44 = vadd.f32 %v1341_v34, %v1337_v23  ;;  %v1305_v46 = vmax.f32 %v1199_v37, 0.0  ;;  %v1202_v48 = vpop.f32.mrb[14].mxu0 }
 0x232   : > { %v1343_v45 = vmul.f32 %v1324_v21, %v1303_v35  ;;  %v1288_v47 = vadd.f32 %v1287_v42, %v1099_v62  ;;  %v1344_v50 = vmul.f32 %v1329_v43, %v1304_v40  ;;  %v1203_v52 = vadd.f32 %v1202_v48, %v2578_v3  ;;  %v1204_v53 = vpop.f32.mrb[15].mxu0  ;;  %v1334_v62 = vpop.permute.xlu1 %1333 }
 0x233   : > { %v1370_v49 = vadd.f32 %v1342_v39, %v1338_v27  ;;  %v1306_v51 = vmax.f32 %v1286_v41, 0.0  ;;  %v1345_v55 = vmul.f32 %v1329_v43, %v1305_v46  ;;  %v1205_v58 = vadd.f32 %v1204_v53, %v2578_v3  ;;  %v1392_v34 = vpop.permute.xlu0 %1391 }
 0x234   : > { %v1379_v54 = vadd.f32 %v1343_v45, %v1339_v33  ;;  %v1307_v56 = vmax.f32 %v1288_v47, 0.0  ;;  %v1291_v57 = vpop.f32.mrb[14].mxu1  ;;  %v1353_v29 = vadd.f32 %v1352_v38, %v1344_v50  ;;  %v1308_v60 = vmax.f32 %v1203_v52, 0.0 }
 0x235   : > { %v1346_v59 = vmul.f32 %v1329_v43, %v1306_v51  ;;  %v1292_v61 = vadd.f32 %v1291_v57, %v2578_v3  ;;  %v1293_v63 = vpop.f32.mrb[15].mxu1  ;;  %v1362_v0 = vadd.f32 %v1361_v44, %v1345_v55  ;;  %v1309_v4 = vmax.f32 %v1205_v58, 0.0 }
 0x236   : > { %v1347_v2 = vmul.f32 %v1329_v43, %v1307_v56  ;;  %v1294_v5 = vadd.f32 %v1293_v63, %v2578_v3  ;;  %v1348_v7 = vmul.f32 %v1334_v62, %v1308_v60  ;;  %v1409_v27 = vunpack.c.l.s4 %v2237_v26 }
 0x237   : > { %v1371_v6 = vadd.f32 %v1370_v49, %v1346_v59  ;;  %v1310_v8 = vmax.f32 %v1292_v61, 0.0  ;;  %v1349_v10 = vmul.f32 %v1334_v62, %v1309_v4  ;;  %v1396_v31 = vsub.s32 0, %v1395_v20 }
 0x238   : > { %v1380_v9 = vadd.f32 %v1379_v54, %v1347_v2  ;;  %v1311_v1 = vmax.f32 %v1294_v5, 0.0  ;;  %v1354_v12 = vadd.f32 %v1353_v29, %v1348_v7  ;;  %v1410_v39 = vunpack.c.0.s8 %v1409_v27 }
 0x239   : > { %v1350_v13 = vmul.f32 %v1334_v62, %v1310_v8  ;;  %v1363_v14 = vadd.f32 %v1362_v0, %v1349_v10  ;;  %v1397_v42 = vrot.slane %v1392_v34, %v1396_v31  ;;  %vm1433_vm2 = vcmp.lt.s32.totalorder %v1394_v11, 512 }
 0x23a   : > { %v1351_v15 = vmul.f32 %v1334_v62, %v1311_v1  ;;  %v1355_v16 = vrot.slane %v1354_v12, 4  ;;  %v1413_v49 = vsub.s32 %v1410_v39, %v1395_v20 }
 0x23b   : > { %v1372_v17 = vadd.f32 %v1371_v6, %v1350_v13  ;;  %v1364_v18 = vrot.slane %v1363_v14, 4 }
 0x23c   : > { %v1381_v19 = vadd.f32 %v1380_v9, %v1351_v15  ;;  %v1356_v21 = vadd.f32 %v1355_v16, %v1354_v12 }
 0x23d   : > { %v1373_v22 = vrot.slane %v1372_v17, 4  ;;  %v1365_v23 = vadd.f32 %v1364_v18, %v1363_v14 }
 0x23e   : > { %v1382_v3 = vrot.slane %v1381_v19, 4  ;;  %v1357_v24 = vrot.slane %v1356_v21, 2 }
 0x23f   : > { %v1374_v25 = vadd.f32 %v1373_v22, %v1372_v17  ;;  %v1366_v28 = vrot.slane %v1365_v23, 2 }
 0x240   : > { %v1383_v30 = vadd.f32 %v1382_v3, %v1381_v19  ;;  %v1358_v32 = vadd.f32 %v1357_v24, %v1356_v21 }
 0x241   : > { %v1375_v33 = vrot.slane %v1374_v25, 2  ;;  %v1367_v35 = vadd.f32 %v1366_v28, %v1365_v23 }
 0x242   : > { %v1384_v36 = vrot.slane %v1383_v30, 2  ;;  %v1359_v37 = vrot.slane %v1358_v32, 1 }
 0x243   : > { %v1376_v38 = vadd.f32 %v1375_v33, %v1374_v25  ;;  %v1368_v40 = vrot.slane %v1367_v35, 1 }
 0x244   : > { %v1385_v41 = vadd.f32 %v1384_v36, %v1383_v30  ;;  %v1360_v43 = vadd.f32 %v1359_v37, %v1358_v32 }
 0x245   : > { %v1377_v44 = vrot.slane %v1376_v38, 1  ;;  %v1369_v45 = vadd.f32 %v1368_v40, %v1367_v35 }
 0x246   : > { %v1386_v46 = vrot.slane %v1385_v41, 1  ;;  %v1398_v47 = vadd.f32 %v1397_v42, %v1360_v43 }
 0x247   : > { %v1378_v48 = vadd.f32 %v1377_v44, %v1376_v38  ;;  %v1399_v50 = vadd.f32 %v1397_v42, %v1369_v45 }
 0x248   : > { %v1387_v51 = vadd.f32 %v1386_v46, %v1385_v41 }
 0x249   : > { %v1400_v52 = vadd.f32 %v1397_v42, %v1378_v48  ;;  %v1406_v54 = vcombine.low %v1398_v47, %v1399_v50 }
 0x24a   : > { %v1401_v53 = vadd.f32 %v1397_v42, %v1387_v51 }
 0x24b   : > { %v1414_v56 = vrot.slane %v1406_v54, %v1413_v49 }
 0x24c   : > { %v1407_v55 = vcombine.low %v1400_v52, %v1401_v53 }
 0x24e   : > { %v1421_v57 = vrot.slane %v1407_v55, %v1413_v49 }
 0x250   : > { %v1422_v58 = vcombine.low %v1414_v56, %v1421_v57 }
 0x252   : > { %v1429_v29 = vrot.slane %v1422_v58, %v1413_v49 }
 0x254   : > { %1435 = vst.msk [vmem:[%s317_s27] sm:$0xf] %vm1433_vm2, %v1429_v29 }
 0x255   : > { %2184 = shalt.err (!%p2181_p3)
}
 0x256   : > { %s2185_s18 = scalar_lea.hbm %s2589_s13, 64  ;;  %s2189_s19 = scalar_lea.hbm %s2639_s8, 256 }
 0x257   : > { %p2186_p4 = scmp.ne.s32.totalorder %s2589_s13, %s2185_s18  ;;  %p2190_p9 = scmp.lt.u32.totalorder %s2589_s13, %s2639_s8 }
 0x258   : > { %p2191_p10 = scmp.lt.u32.totalorder %s2189_s19, %s2185_s18  ;;  %p2193_p12 = scmp.lt.u32.totalorder %s2185_s18, %s2589_s13 }
 0x259   : > { %p2187_p7 = pnand %p2186_p4, %p2322_p5 }
 0x25a   : > { %p2192_p11 = por %p2191_p10, %p2190_p9 }
 0x25b   : > { %p2188_p8 = pneg %p2187_p7 }
 0x25c   : > { %p2194_p13 = por %p2193_p12, %p2192_p11 }
 0x25e   : > { %p2195_p0 = pnand %p2194_p13, %p2188_p8 }
 0x260   : > { %2198 = shalt.err (!%p2195_p0)
}
 0x261   : > { %2127 = dma.vmem_to_hbm [thread:$0]  (%p2322_p5), %s2591_s28, 64, %s2589_s13, %s1437_s14  }
 0x262 PF: > { %p2133_p1 = scmp.ge.s32.totalorder %s2233_s10, 2  ;;  %s1463_s7 = sand.u32 1, %s2221_s29  }
 0x263   : > { %s1464_s11 = scalar_lea.sflag [#allocation4], %s1463_s7 }
 0x264   : > { %p2130_p2 = pnand %p2133_p1, %p2326_p6 }
 0x266   : > { %2216 = dma.done.wait (!%p2130_p2), %s1464_s11, 64  }
 0x267   : > { %2218 = vsyncadd (!%p2130_p2), %s1464_s11, 4294967232  ;;  %p20_p3 = scmp.ge.s32.totalorder %s2310_s12, 6   ;;  %s2644_s29 = smov %s2225_s30 }
 0x268   : > { %s2645_s30 = smov %s2229_s9  ;;  %s2646_s9 = smov %s2320_s15 }
 0x269   : > { %s2647_s10 = smov %s2310_s12  ;;  %22 = sbr.rel (!%p20_p3) target bundleno = 6 (0x6), region = 90 }
 0x270   :  { %1469 = vsyncpa [#allocation4], 1 }
 0x271   :  { %1471 = vsyncpa [#allocation4 + $0x1], 1 }

</bundles_post_ra>
